<compile_context>
chip_gen: v6e
topology: v6e:2x2x1
jax: 0.10.0
libtpu: 0.0.40
codegen_flags: <defaults>
</compile_context>

<pallas_src>
import jax
import jax.numpy as jnp
from jax.experimental import pallas as pl
from jax.experimental.pallas import tpu as pltpu


def _round_up(x: int, m: int) -> int:
    return (x + m - 1) // m * m


def _onehot_mix_row_kernel(x_ref, t_ref, row_ref):
    """Per-row  sum_c t * log_softmax(x)  for one (tile_b, C_pad) tile."""
    x = x_ref[...].astype(jnp.float32)                           # (tb, Cp)
    t = t_ref[...].astype(jnp.float32)                           # (tb, Cp)

    # numerically stable per-row logsumexp
    m = jnp.max(x, axis=-1, keepdims=True)                       # (tb, 1)
    sumexp = jnp.sum(jnp.exp(x - m), axis=-1, keepdims=True)     # (tb, 1)
    lse = m + jnp.log(sumexp)                                    # (tb, 1)

    # folded:  sum_c t*(x - lse) = sum_c(t*x) - lse * sum_c(t)
    tx = jnp.sum(t * x, axis=-1, keepdims=True)                  # (tb, 1)
    st = jnp.sum(t, axis=-1, keepdims=True)                      # (tb, 1)

    row_ref[...] = tx - lse * st                                 # (tb, 1)


def onehot_mix_loss(mix_input: jax.Array, mix_target: jax.Array, *, tile_b: int | None = None) -> jax.Array:
    """Pallas implementation of OneHotMixLoss.forward for 2-D (B, C) inputs."""
    assert mix_input.shape == mix_target.shape
    B, C = mix_input.shape

    itemsize = max(mix_input.dtype.itemsize, mix_target.dtype.itemsize)
    sublane = {4: 8, 2: 16, 1: 32}.get(itemsize, 8)

    # lane-dense class dimension
    C_pad = _round_up(C, 128)

    if tile_b is None:
        # Largest batch tile that keeps (2 inputs x 2 pipeline buffers) plus f32
        # temporaries comfortably inside the smallest per-generation VMEM budget
        # (v7x: 64 MiB physical / 32 MiB default scoped).
        budget = 24 * 1024 * 1024
        per_row = C_pad * (2 * 2 * itemsize + 4 * 4) + 2 * 128 * 4
        tile_b = min(1024, budget // per_row)
    tile_b = min(tile_b, _round_up(B, sublane))
    tile_b = max(sublane, _round_up(tile_b, sublane))

    B_pad = _round_up(B, tile_b)

    x, t = mix_input, mix_target
    if (B_pad, C_pad) != (B, C):
        neg_big = float(jnp.finfo(jnp.float32).min / 2)   # exp(pad - m) == 0, 0*pad finite
        x = jnp.pad(x, ((0, B_pad - B), (0, C_pad - C)), constant_values=neg_big)
        t = jnp.pad(t, ((0, B_pad - B), (0, C_pad - C)), constant_values=0.0)

    grid = (B_pad // tile_b,)

    cost = pl.CostEstimate(
        flops=5 * B_pad * C_pad,
        transcendentals=B_pad * C_pad + B_pad,
        bytes_accessed=B_pad * C_pad * (mix_input.dtype.itemsize + mix_target.dtype.itemsize)
        + B_pad * 4,
    )

    row_terms = pl.pallas_call(
        _onehot_mix_row_kernel,
        out_shape=jax.ShapeDtypeStruct((B_pad, 1), jnp.float32),
        grid=grid,
        in_specs=[
            pl.BlockSpec((tile_b, C_pad), lambda i: (i, 0)),
            pl.BlockSpec((tile_b, C_pad), lambda i: (i, 0)),
        ],
        out_specs=pl.BlockSpec((tile_b, 1), lambda i: (i, 0)),
        compiler_params=pltpu.CompilerParams(
            dimension_semantics=("parallel",),     # no carried state -> megacore-safe
            vmem_limit_bytes=32 * 1024 * 1024,
        ),
        cost_estimate=cost,
    )(x, t)

    # Padded rows have t == 0 -> contribute exactly 0, so sum over B_pad == sum over B.
    return -(jnp.sum(row_terms) / jnp.float32(B))


def _reference(mix_input, mix_target):
    log_prob = jax.nn.log_softmax(mix_input.astype(jnp.float32), axis=-1)
    return -jnp.mean(jnp.sum(log_prob * mix_target.astype(jnp.float32), axis=1))


if __name__ == "__main__":
    key = jax.random.PRNGKey(0)

    def make_inputs(k, B, C):
        k_x, k_a, k_b, k_lam = jax.random.split(k, 4)
        x = jax.random.normal(k_x, (B, C), dtype=jnp.float32)
        labels_a = jax.random.randint(k_a, (B,), 0, C)
        labels_b = jax.random.randint(k_b, (B,), 0, C)
        lam = jax.random.uniform(k_lam, (B, 1), dtype=jnp.float32)
        t = lam * jax.nn.one_hot(labels_a, C, dtype=jnp.float32) + \
            (1.0 - lam) * jax.nn.one_hot(labels_b, C, dtype=jnp.float32)
        return x, t

    # primary test: small mixup-style shapes
    k1, k2 = jax.random.split(key)
    x, t = make_inputs(k1, 16, 32)
    loss = jax.block_until_ready(onehot_mix_loss(x, t))
    ref = _reference(x, t)
    assert jnp.allclose(loss, ref, rtol=1e-5, atol=1e-5), (loss, ref)

    # ragged shapes exercise batch/class padding paths
    x2, t2 = make_inputs(k2, 50, 200)
    loss2 = jax.block_until_ready(onehot_mix_loss(x2, t2))
    ref2 = _reference(x2, t2)
    assert jnp.allclose(loss2, ref2, rtol=1e-5, atol=1e-5), (loss2, ref2)

    print("KERNEL_OK")
</pallas_src>

<mosaic_0001>
module attributes {stable_mosaic.version = 11 : i64} {
  func.func @_onehot_mix_row_kernel(%arg0: i32, %arg1: memref<16x128xf32, #tpu.memory_space<vmem>>, %arg2: memref<16x128xf32, #tpu.memory_space<vmem>>, %arg3: memref<16x1xf32, #tpu.memory_space<vmem>>) attributes {dimension_semantics = [#tpu.dimension_semantics<parallel>], iteration_bounds = array<i64: 1>, scalar_prefetch = 0 : i64, scratch_operands = 0 : i64, tpu.core_type = #tpu.core_type<tc>, window_params = [{transform_indices = @transform_0, window_bounds = array<i64: 16, 128>}, {transform_indices = @transform_1, window_bounds = array<i64: 16, 128>}, {transform_indices = @transform_2, window_bounds = array<i64: 16, 1>}]} {
    %c0 = arith.constant 0 : index
    %c0_0 = arith.constant 0 : index
    %0 = vector.load %arg1[%c0, %c0_0] : memref<16x128xf32, #tpu.memory_space<vmem>>, vector<16x128xf32>
    %c0_1 = arith.constant 0 : index
    %c0_2 = arith.constant 0 : index
    %1 = vector.load %arg2[%c0_1, %c0_2] : memref<16x128xf32, #tpu.memory_space<vmem>>, vector<16x128xf32>
    %cst = arith.constant dense<0xFF800000> : vector<16xf32>
    %2 = vector.multi_reduction <maximumf>, %0, %cst [1] : vector<16x128xf32> to vector<16xf32>
    %3 = vector.shape_cast %2 : vector<16xf32> to vector<16x1xf32>
    %4 = vector.broadcast %3 : vector<16x1xf32> to vector<16x128xf32>
    %5 = arith.subf %0, %4 : vector<16x128xf32>
    %6 = math.exp %5 : vector<16x128xf32>
    %cst_3 = arith.constant dense<0.000000e+00> : vector<16xf32>
    %7 = vector.multi_reduction <add>, %6, %cst_3 [1] : vector<16x128xf32> to vector<16xf32>
    %8 = vector.shape_cast %7 : vector<16xf32> to vector<16x1xf32>
    %9 = math.log %8 : vector<16x1xf32>
    %10 = arith.addf %3, %9 : vector<16x1xf32>
    %11 = arith.mulf %1, %0 : vector<16x128xf32>
    %cst_4 = arith.constant dense<0.000000e+00> : vector<16xf32>
    %12 = vector.multi_reduction <add>, %11, %cst_4 [1] : vector<16x128xf32> to vector<16xf32>
    %13 = vector.shape_cast %12 : vector<16xf32> to vector<16x1xf32>
    %cst_5 = arith.constant dense<0.000000e+00> : vector<16xf32>
    %14 = vector.multi_reduction <add>, %1, %cst_5 [1] : vector<16x128xf32> to vector<16xf32>
    %15 = vector.shape_cast %14 : vector<16xf32> to vector<16x1xf32>
    %16 = arith.mulf %10, %15 : vector<16x1xf32>
    %17 = arith.subf %13, %16 : vector<16x1xf32>
    %c0_6 = arith.constant 0 : index
    %c0_7 = arith.constant 0 : index
    %18 = vector.load %arg3[%c0_6, %c0_7] : memref<16x1xf32, #tpu.memory_space<vmem>>, vector<16x1xf32>
    tpu.vector_store %arg3[%c0_6, %c0_7], %17 {strides = array<i32>} : memref<16x1xf32, #tpu.memory_space<vmem>>, vector<16x1xf32>,
    return
  }
  func.func @transform_0(%arg0: i32) -> (i32, i32) {
    %c0_i32 = arith.constant 0 : i32
    %c0_i32_0 = arith.constant 0 : i32
    return %arg0, %c0_i32 : i32, i32
  }
  func.func @transform_1(%arg0: i32) -> (i32, i32) {
    %c0_i32 = arith.constant 0 : i32
    %c0_i32_0 = arith.constant 0 : i32
    return %arg0, %c0_i32 : i32, i32
  }
  func.func @transform_2(%arg0: i32) -> (i32, i32) {
    %c0_i32 = arith.constant 0 : i32
    %c0_i32_0 = arith.constant 0 : i32
    return %arg0, %c0_i32 : i32, i32
  }
}

</mosaic_0001>

<bundles_post_ra>
// kernel: tpu_custom_call.1
= control target key start
LH: loop header
LB: loop body
LE: loop exit
PB: predicated region body
PF: predicated region fallthrough
CT: control target
= control target key end

     0   :  { %7 = vsyncpa [#allocation3], 0  ;;  %s173_s0 = inlined_call_operand.hbm [shape: f32[16,128], index: 0, kind: input, shape index: {}]   ;;  %s174_s1 = inlined_call_operand.hbm [shape: f32[16,128], index: 1, kind: input, shape index: {}]   ;;  %s175_s2 = inlined_call_operand.vmem [shape: f32[16,1], index: 2, kind: output, shape index: {}]  }
   0x1   :  { %8 = vsyncpa [#allocation5], 0  ;;  %s142_s9 = smov [#allocation2]  }
   0x2   :  { %s14_s10 = sshll.u32 %s142_s9, 4  ;;  %s15_s10 = int_to_ptr.vmem [resolvable:$true] %s14_s10 }
   0x3   :  { %s106_s11 = scalar_lea.vmem %s15_s10, 256  ;;  %p111_p1 = scmp.lt.s32.totalorder %s15_s10, %s15_s10 }
   0x4   :  { %p107_p0 = scmp.ne.s32.totalorder %s15_s10, %s106_s11  ;;  %p112_p2 = scmp.lt.s32.totalorder %s106_s11, %s106_s11 }
   0x6   :  { %p113_p3 = por %p112_p2, %p111_p1 }
   0x8   :  { %p114_p4 = pnand %p113_p3, %p107_p0 }
   0xa   :  { %117 = shalt.err (!%p114_p4)
}
   0xb   :  { %s143_s12 = smov 128   ;;  %s144_s13 = smov 8  }
   0xc   :  { %20 = dma.hbm_to_vmem [thread:$0]  %s173_s0, 256, %s15_s10, [#allocation3], %s143_s12, %s143_s12, %s144_s13  }
   0xd   :  { %s145_s16 = smov [#allocation4]  }
   0xe   :  { %s26_s17 = sshll.u32 %s145_s16, 4  ;;  %s27_s17 = int_to_ptr.vmem [resolvable:$true] %s26_s17 }
   0xf   :  { %s126_s18 = scalar_lea.vmem %s27_s17, 256  ;;  %p131_p6 = scmp.lt.s32.totalorder %s27_s17, %s27_s17 }
  0x10   :  { %p127_p5 = scmp.ne.s32.totalorder %s27_s17, %s126_s18  ;;  %p132_p7 = scmp.lt.s32.totalorder %s126_s18, %s126_s18 }
  0x12   :  { %p133_p8 = por %p132_p7, %p131_p6 }
  0x14   :  { %p134_p9 = pnand %p133_p8, %p127_p5 }
  0x16   :  { %137 = shalt.err (!%p134_p9)
}
  0x17   :  { %32 = dma.hbm_to_vmem [thread:$0]  %s174_s1, 256, %s27_s17, [#allocation5], %s143_s12, %s143_s12, %s144_s13  }
  0x18   :  { %138 = dma.done.wait [#allocation3], 256  }
  0x19   :  { %139 = vsyncadd [#allocation3], 4294967040 }
  0x1a   :  { %140 = dma.done.wait [#allocation5], 256  }
  0x1b   :  { %141 = vsyncadd [#allocation5], 4294967040  ;;  %v39_v0 = vld [vmem:[#allocation2] sm:$0xff]  ;;  %v40_v1 = vld [vmem:[#allocation2 + $0x8] sm:$0xff]  ;;  %vm77_vm0 = vcmask 7168  }
  0x1c   :  { %43 = vmax.xlane.f32.xlu0 %v39_v0  ;;  %v41_v2 = vld [vmem:[#allocation4] sm:$0xff]  ;;  %v42_v12 = vld [vmem:[#allocation4 + $0x8] sm:$0xff] }
  0x1d   :  { %v63_v3 = vmul.f32 %v41_v2, %v39_v0  ;;  %v64_v13 = vmul.f32 %v42_v12, %v40_v1 }
  0x20   :  { %45 = vmax.xlane.f32.xlu0 %v40_v1 }
  0x24   :  { %69 = vadd.xlane.f32.xlu0 %v41_v2 }
  0x28   :  { %65 = vadd.xlane.f32.xlu0 %v63_v3 }
  0xa5   :  { %v44_v4 = vpop.xlane.xlu0 %43 }
  0xa6   :  { %v47_v5 = vsub.f32 %v39_v0, %v44_v4 }
  0xa8   :  { %v49_v6 = vmul.f32 1.442695, %v47_v5 }
  0xa9   :  { %v46_v7 = vpop.xlane.xlu0 %45 }
  0xaa   :  { %90 = vpow2.f32 %v49_v6  ;;  %v48_v8 = vsub.f32 %v40_v1, %v46_v7 }
  0xac   :  { %v51_v9 = vmul.f32 1.442695, %v48_v8 }
  0xad   :  { %v70_v16 = vpop.xlane.xlu0 %69 }
  0xae   :  { %92 = vpow2.f32 %v51_v9 }
  0xb1   :  { %v66_v22 = vpop.xlane.xlu0 %65 }
  0xb7   :  { %v91_v10 = vpop.eup %90 }
  0xb8   :  { %53 = vadd.xlane.f32.xlu1 %v91_v10 }
  0xbb   :  { %v93_v11 = vpop.eup %92 }
  0xbc   :  { %55 = vadd.xlane.f32.xlu1 %v93_v11 }
  0xc0   :  { %71 = vadd.xlane.f32.xlu1 %v42_v12 }
  0xc4   :  { %67 = vadd.xlane.f32.xlu1 %v64_v13 }
 0x141   :  { %v54_v14 = vpop.xlane.xlu1 %53 }
 0x142   :  { %94 = vlog2.f32 %v54_v14 }
 0x145   :  { %v56_v15 = vpop.xlane.xlu1 %55 }
 0x146   :  { %96 = vlog2.f32 %v56_v15 }
 0x149   :  { %v72_v19 = vpop.xlane.xlu1 %71 }
 0x14d   :  { %v68_v27 = vpop.xlane.xlu1 %67 }
 0x14f   :  { %v95_v17 = vpop.eup %94 }
 0x150   :  { %v58_v18 = vmul.f32 0.6931472, %v95_v17 }
 0x152   :  { %v61_v20 = vadd.f32 %v58_v18, %v44_v4 }
 0x153   :  { %v97_v21 = vpop.eup %96 }
 0x154   :  { %v60_v23 = vmul.f32 0.6931472, %v97_v21  ;;  %v73_v24 = vmul.f32 %v70_v16, %v61_v20 }
 0x156   :  { %v62_v25 = vadd.f32 %v60_v23, %v46_v7  ;;  %v75_v26 = vsub.f32 %v66_v22, %v73_v24 }
 0x158   :  { %v74_v28 = vmul.f32 %v72_v19, %v62_v25  ;;  %78 = vst.msk [vmem:[%s175_s2] sm:$0xff] %vm77_vm0, %v75_v26 }
 0x15a   :  { %v76_v29 = vsub.f32 %v68_v27, %v74_v28 }
 0x15c   :  { %79 = vst.msk [vmem:[%s175_s2 + $0x8] sm:$0xff] %vm77_vm0, %v76_v29 }
 0x15d   :  { %84 = vsyncpa [#allocation3], 1 }
 0x15e   :  { %85 = vsyncpa [#allocation5], 1 }

</bundles_post_ra>
